<compile_context>
chip_gen: v7x
topology: tpu7x:2x2x1
jax: 0.10.0
libtpu: 0.0.40
codegen_flags: <defaults>
</compile_context>

<pallas_src>
import jax
import jax.numpy as jnp
from jax.experimental import pallas as pl
from jax.experimental.pallas import tpu as pltpu


def all_to_all_module(input1, output1):
    """Simulates AllToAll.forward(input1, output1) == dist.all_to_all.

    input1 : [W, N, D]  per-rank inputs stacked on axis 0 (N = W * C)
    output1: [W, N, D]  pre-allocated output buffer (shape/dtype contract only)
    returns: [W, N, D]  where out[r, j*C:(j+1)*C] = input1[j, r*C:(r+1)*C]
    """
    W, N, D = input1.shape
    if output1.shape != input1.shape or output1.dtype != input1.dtype:
        raise ValueError("output1 must match input1 in shape and dtype")
    if N % W != 0:
        raise ValueError("dim 0 of each rank's tensor must split evenly across ranks")
    # TODO(synk): JAX is functional, so we return a fresh array instead of writing
    # into `output1` in place (true aliasing needs jit buffer donation outside the kernel).

    C = N // W                                   # rows exchanged per peer
    itemsize = jnp.dtype(input1.dtype).itemsize

    def a2a_dma_kernel(x_hbm, o_hbm, sem):
        # Destination rank handled by this grid step.
        r = pl.program_id(0)
        # r*C is always a multiple of C (helps Mosaic generate aligned descriptors).
        src_start = pl.multiple_of(r * C, C)
        # Issue one HBM->HBM DMA per source rank j:
        #   out[r, j*C:(j+1)*C, :] <- in[j, r*C:(r+1)*C, :]
        # Each transfer is a contiguous (C, D) slab on both sides.  All W copies
        # are launched before any wait so they overlap on the DMA engines.
        copies = []
        for j in range(W):                       # static unroll (W is a Python int)
            cp = pltpu.make_async_copy(
                x_hbm.at[j, pl.ds(src_start, C), :],
                o_hbm.at[r, pl.ds(j * C, C), :],
                sem.at[j],
            )
            cp.start()
            copies.append(cp)
        for cp in copies:
            cp.wait()

    return pl.pallas_call(
        a2a_dma_kernel,
        out_shape=jax.ShapeDtypeStruct((W, N, D), input1.dtype),
        grid_spec=pltpu.PrefetchScalarGridSpec(
            num_scalar_prefetch=0,
            grid=(W,),                                   # destination rank
            in_specs=[pl.BlockSpec(memory_space=pl.ANY)],   # raw HBM ref, no auto-DMA
            out_specs=pl.BlockSpec(memory_space=pl.ANY),    # raw HBM ref, written via DMA
            scratch_shapes=[pltpu.SemaphoreType.DMA((W,))],
        ),
        compiler_params=pltpu.CompilerParams(
            # Grid steps write disjoint output rows; "arbitrary" is safe and,
            # since the kernel is DMA-engine bound (not core bound), there is
            # no measurable upside to megacore sharding here.
            dimension_semantics=("arbitrary",),
        ),
        cost_estimate=pl.CostEstimate(
            flops=0,
            transcendentals=0,
            bytes_accessed=2 * W * N * D * itemsize,     # one HBM read + one HBM write
        ),
    )(input1)


def _reference(input1):
    W, N, D = input1.shape
    C = N // W
    blocks = input1.reshape(W, W, C, D)          # [src_rank, chunk, C, D]
    return jnp.transpose(blocks, (1, 0, 2, 3)).reshape(W, N, D)


if __name__ == "__main__":
    W, N, D = 4, 32, 32    # 4 simulated ranks, per-rank tensor [32, 32], chunk C = 8
    key = jax.random.PRNGKey(0)
    k1, _ = jax.random.split(key)
    input1 = jax.random.normal(k1, (W, N, D), dtype=jnp.float32)
    output1 = jnp.zeros((W, N, D), dtype=jnp.float32)   # pre-allocated buffer (contract only)

    out = all_to_all_module(input1, output1)
    out = jax.block_until_ready(out)

    ref = _reference(input1)
    assert out.shape == output1.shape and out.dtype == output1.dtype
    assert jnp.array_equal(out, ref), "mismatch vs. reference all_to_all"

    print("KERNEL_OK")
</pallas_src>

<mosaic_0001>
module attributes {stable_mosaic.version = 11 : i64} {
  func.func @a2a_dma_kernel(%arg0: i32, %arg1: memref<4x32x32xf32, #tpu.memory_space<any>>, %arg2: memref<4x32x32xf32, #tpu.memory_space<any>>, %arg3: memref<4x!tpu.dma_semaphore, #tpu.memory_space<semaphore_mem>>) attributes {dimension_semantics = [#tpu.dimension_semantics<arbitrary>], iteration_bounds = array<i64: 4>, scalar_prefetch = 0 : i64, scratch_operands = 1 : i64, tpu.core_type = #tpu.core_type<tc>, window_params = [{}, {}]} {
    %c8_i32 = arith.constant 8 : i32
    %0 = arith.muli %arg0, %c8_i32 : i32
    %1 = tpu.assume_multiple %0, 8 : i32
    %c0_i32 = arith.constant 0 : i32
    %c0_i32_0 = arith.constant 0 : i32
    %c0_i32_1 = arith.constant 0 : i32
    %2 = tpu.memref_slice %arg1[%c0_i32, %1, %c0_i32_1] : memref<4x32x32xf32, #tpu.memory_space<any>> -> memref<1x8x32xf32, #tpu.memory_space<any>>
    %3 = tpu.memref_squeeze %2 : memref<1x8x32xf32, #tpu.memory_space<any>> -> memref<8x32xf32, #tpu.memory_space<any>>
    %c0_i32_2 = arith.constant 0 : i32
    %c0_i32_3 = arith.constant 0 : i32
    %4 = tpu.memref_slice %arg2[%arg0, %c0_i32_2, %c0_i32_3] : memref<4x32x32xf32, #tpu.memory_space<any>> -> memref<1x8x32xf32, #tpu.memory_space<any>>
    %5 = tpu.memref_squeeze %4 : memref<1x8x32xf32, #tpu.memory_space<any>> -> memref<8x32xf32, #tpu.memory_space<any>>
    %6 = tpu.memref_slice %arg3[%c0_i32_0] : memref<4x!tpu.dma_semaphore, #tpu.memory_space<semaphore_mem>> -> memref<1x!tpu.dma_semaphore, #tpu.memory_space<semaphore_mem>>
    %7 = tpu.memref_squeeze %6 : memref<1x!tpu.dma_semaphore, #tpu.memory_space<semaphore_mem>> -> memref<!tpu.dma_semaphore, #tpu.memory_space<semaphore_mem>>
    tpu.enqueue_dma source(%3 : memref<8x32xf32, #tpu.memory_space<any>>) target(%5 : memref<8x32xf32, #tpu.memory_space<any>>) target_semaphore(%7 : memref<!tpu.dma_semaphore, #tpu.memory_space<semaphore_mem>>)
    %c1_i32 = arith.constant 1 : i32
    %c1_i32_4 = arith.constant 1 : i32
    %c0_i32_5 = arith.constant 0 : i32
    %8 = tpu.memref_slice %arg1[%c1_i32, %1, %c0_i32_5] : memref<4x32x32xf32, #tpu.memory_space<any>> -> memref<1x8x32xf32, #tpu.memory_space<any>>
    %9 = tpu.memref_squeeze %8 : memref<1x8x32xf32, #tpu.memory_space<any>> -> memref<8x32xf32, #tpu.memory_space<any>>
    %c8_i32_6 = arith.constant 8 : i32
    %c0_i32_7 = arith.constant 0 : i32
    %10 = tpu.memref_slice %arg2[%arg0, %c8_i32_6, %c0_i32_7] : memref<4x32x32xf32, #tpu.memory_space<any>> -> memref<1x8x32xf32, #tpu.memory_space<any>>
    %11 = tpu.memref_squeeze %10 : memref<1x8x32xf32, #tpu.memory_space<any>> -> memref<8x32xf32, #tpu.memory_space<any>>
    %12 = tpu.memref_slice %arg3[%c1_i32_4] : memref<4x!tpu.dma_semaphore, #tpu.memory_space<semaphore_mem>> -> memref<1x!tpu.dma_semaphore, #tpu.memory_space<semaphore_mem>>
    %13 = tpu.memref_squeeze %12 : memref<1x!tpu.dma_semaphore, #tpu.memory_space<semaphore_mem>> -> memref<!tpu.dma_semaphore, #tpu.memory_space<semaphore_mem>>
    tpu.enqueue_dma source(%9 : memref<8x32xf32, #tpu.memory_space<any>>) target(%11 : memref<8x32xf32, #tpu.memory_space<any>>) target_semaphore(%13 : memref<!tpu.dma_semaphore, #tpu.memory_space<semaphore_mem>>)
    %c2_i32 = arith.constant 2 : i32
    %c2_i32_8 = arith.constant 2 : i32
    %c0_i32_9 = arith.constant 0 : i32
    %14 = tpu.memref_slice %arg1[%c2_i32, %1, %c0_i32_9] : memref<4x32x32xf32, #tpu.memory_space<any>> -> memref<1x8x32xf32, #tpu.memory_space<any>>
    %15 = tpu.memref_squeeze %14 : memref<1x8x32xf32, #tpu.memory_space<any>> -> memref<8x32xf32, #tpu.memory_space<any>>
    %c16_i32 = arith.constant 16 : i32
    %c0_i32_10 = arith.constant 0 : i32
    %16 = tpu.memref_slice %arg2[%arg0, %c16_i32, %c0_i32_10] : memref<4x32x32xf32, #tpu.memory_space<any>> -> memref<1x8x32xf32, #tpu.memory_space<any>>
    %17 = tpu.memref_squeeze %16 : memref<1x8x32xf32, #tpu.memory_space<any>> -> memref<8x32xf32, #tpu.memory_space<any>>
    %18 = tpu.memref_slice %arg3[%c2_i32_8] : memref<4x!tpu.dma_semaphore, #tpu.memory_space<semaphore_mem>> -> memref<1x!tpu.dma_semaphore, #tpu.memory_space<semaphore_mem>>
    %19 = tpu.memref_squeeze %18 : memref<1x!tpu.dma_semaphore, #tpu.memory_space<semaphore_mem>> -> memref<!tpu.dma_semaphore, #tpu.memory_space<semaphore_mem>>
    tpu.enqueue_dma source(%15 : memref<8x32xf32, #tpu.memory_space<any>>) target(%17 : memref<8x32xf32, #tpu.memory_space<any>>) target_semaphore(%19 : memref<!tpu.dma_semaphore, #tpu.memory_space<semaphore_mem>>)
    %c3_i32 = arith.constant 3 : i32
    %c3_i32_11 = arith.constant 3 : i32
    %c0_i32_12 = arith.constant 0 : i32
    %20 = tpu.memref_slice %arg1[%c3_i32, %1, %c0_i32_12] : memref<4x32x32xf32, #tpu.memory_space<any>> -> memref<1x8x32xf32, #tpu.memory_space<any>>
    %21 = tpu.memref_squeeze %20 : memref<1x8x32xf32, #tpu.memory_space<any>> -> memref<8x32xf32, #tpu.memory_space<any>>
    %c24_i32 = arith.constant 24 : i32
    %c0_i32_13 = arith.constant 0 : i32
    %22 = tpu.memref_slice %arg2[%arg0, %c24_i32, %c0_i32_13] : memref<4x32x32xf32, #tpu.memory_space<any>> -> memref<1x8x32xf32, #tpu.memory_space<any>>
    %23 = tpu.memref_squeeze %22 : memref<1x8x32xf32, #tpu.memory_space<any>> -> memref<8x32xf32, #tpu.memory_space<any>>
    %24 = tpu.memref_slice %arg3[%c3_i32_11] : memref<4x!tpu.dma_semaphore, #tpu.memory_space<semaphore_mem>> -> memref<1x!tpu.dma_semaphore, #tpu.memory_space<semaphore_mem>>
    %25 = tpu.memref_squeeze %24 : memref<1x!tpu.dma_semaphore, #tpu.memory_space<semaphore_mem>> -> memref<!tpu.dma_semaphore, #tpu.memory_space<semaphore_mem>>
    tpu.enqueue_dma source(%21 : memref<8x32xf32, #tpu.memory_space<any>>) target(%23 : memref<8x32xf32, #tpu.memory_space<any>>) target_semaphore(%25 : memref<!tpu.dma_semaphore, #tpu.memory_space<semaphore_mem>>)
    %c0_i32_14 = arith.constant 0 : i32
    %c0_i32_15 = arith.constant 0 : i32
    %c0_i32_16 = arith.constant 0 : i32
    %26 = tpu.memref_slice %arg1[%c0_i32_14, %1, %c0_i32_16] : memref<4x32x32xf32, #tpu.memory_space<any>> -> memref<1x8x32xf32, #tpu.memory_space<any>>
    %27 = tpu.memref_squeeze %26 : memref<1x8x32xf32, #tpu.memory_space<any>> -> memref<8x32xf32, #tpu.memory_space<any>>
    %c0_i32_17 = arith.constant 0 : i32
    %c0_i32_18 = arith.constant 0 : i32
    %28 = tpu.memref_slice %arg2[%arg0, %c0_i32_17, %c0_i32_18] : memref<4x32x32xf32, #tpu.memory_space<any>> -> memref<1x8x32xf32, #tpu.memory_space<any>>
    %29 = tpu.memref_squeeze %28 : memref<1x8x32xf32, #tpu.memory_space<any>> -> memref<8x32xf32, #tpu.memory_space<any>>
    %30 = tpu.memref_slice %arg3[%c0_i32_15] : memref<4x!tpu.dma_semaphore, #tpu.memory_space<semaphore_mem>> -> memref<1x!tpu.dma_semaphore, #tpu.memory_space<semaphore_mem>>
    %31 = tpu.memref_squeeze %30 : memref<1x!tpu.dma_semaphore, #tpu.memory_space<semaphore_mem>> -> memref<!tpu.dma_semaphore, #tpu.memory_space<semaphore_mem>>
    tpu.wait_dma2 semaphore(%31 : memref<!tpu.dma_semaphore, #tpu.memory_space<semaphore_mem>>) src(%27 : memref<8x32xf32, #tpu.memory_space<any>>) dst(%29 : memref<8x32xf32, #tpu.memory_space<any>>)
    %c1_i32_19 = arith.constant 1 : i32
    %c1_i32_20 = arith.constant 1 : i32
    %c0_i32_21 = arith.constant 0 : i32
    %32 = tpu.memref_slice %arg1[%c1_i32_19, %1, %c0_i32_21] : memref<4x32x32xf32, #tpu.memory_space<any>> -> memref<1x8x32xf32, #tpu.memory_space<any>>
    %33 = tpu.memref_squeeze %32 : memref<1x8x32xf32, #tpu.memory_space<any>> -> memref<8x32xf32, #tpu.memory_space<any>>
    %c8_i32_22 = arith.constant 8 : i32
    %c0_i32_23 = arith.constant 0 : i32
    %34 = tpu.memref_slice %arg2[%arg0, %c8_i32_22, %c0_i32_23] : memref<4x32x32xf32, #tpu.memory_space<any>> -> memref<1x8x32xf32, #tpu.memory_space<any>>
    %35 = tpu.memref_squeeze %34 : memref<1x8x32xf32, #tpu.memory_space<any>> -> memref<8x32xf32, #tpu.memory_space<any>>
    %36 = tpu.memref_slice %arg3[%c1_i32_20] : memref<4x!tpu.dma_semaphore, #tpu.memory_space<semaphore_mem>> -> memref<1x!tpu.dma_semaphore, #tpu.memory_space<semaphore_mem>>
    %37 = tpu.memref_squeeze %36 : memref<1x!tpu.dma_semaphore, #tpu.memory_space<semaphore_mem>> -> memref<!tpu.dma_semaphore, #tpu.memory_space<semaphore_mem>>
    tpu.wait_dma2 semaphore(%37 : memref<!tpu.dma_semaphore, #tpu.memory_space<semaphore_mem>>) src(%33 : memref<8x32xf32, #tpu.memory_space<any>>) dst(%35 : memref<8x32xf32, #tpu.memory_space<any>>)
    %c2_i32_24 = arith.constant 2 : i32
    %c2_i32_25 = arith.constant 2 : i32
    %c0_i32_26 = arith.constant 0 : i32
    %38 = tpu.memref_slice %arg1[%c2_i32_24, %1, %c0_i32_26] : memref<4x32x32xf32, #tpu.memory_space<any>> -> memref<1x8x32xf32, #tpu.memory_space<any>>
    %39 = tpu.memref_squeeze %38 : memref<1x8x32xf32, #tpu.memory_space<any>> -> memref<8x32xf32, #tpu.memory_space<any>>
    %c16_i32_27 = arith.constant 16 : i32
    %c0_i32_28 = arith.constant 0 : i32
    %40 = tpu.memref_slice %arg2[%arg0, %c16_i32_27, %c0_i32_28] : memref<4x32x32xf32, #tpu.memory_space<any>> -> memref<1x8x32xf32, #tpu.memory_space<any>>
    %41 = tpu.memref_squeeze %40 : memref<1x8x32xf32, #tpu.memory_space<any>> -> memref<8x32xf32, #tpu.memory_space<any>>
    %42 = tpu.memref_slice %arg3[%c2_i32_25] : memref<4x!tpu.dma_semaphore, #tpu.memory_space<semaphore_mem>> -> memref<1x!tpu.dma_semaphore, #tpu.memory_space<semaphore_mem>>
    %43 = tpu.memref_squeeze %42 : memref<1x!tpu.dma_semaphore, #tpu.memory_space<semaphore_mem>> -> memref<!tpu.dma_semaphore, #tpu.memory_space<semaphore_mem>>
    tpu.wait_dma2 semaphore(%43 : memref<!tpu.dma_semaphore, #tpu.memory_space<semaphore_mem>>) src(%39 : memref<8x32xf32, #tpu.memory_space<any>>) dst(%41 : memref<8x32xf32, #tpu.memory_space<any>>)
    %c3_i32_29 = arith.constant 3 : i32
    %c3_i32_30 = arith.constant 3 : i32
    %c0_i32_31 = arith.constant 0 : i32
    %44 = tpu.memref_slice %arg1[%c3_i32_29, %1, %c0_i32_31] : memref<4x32x32xf32, #tpu.memory_space<any>> -> memref<1x8x32xf32, #tpu.memory_space<any>>
    %45 = tpu.memref_squeeze %44 : memref<1x8x32xf32, #tpu.memory_space<any>> -> memref<8x32xf32, #tpu.memory_space<any>>
    %c24_i32_32 = arith.constant 24 : i32
    %c0_i32_33 = arith.constant 0 : i32
    %46 = tpu.memref_slice %arg2[%arg0, %c24_i32_32, %c0_i32_33] : memref<4x32x32xf32, #tpu.memory_space<any>> -> memref<1x8x32xf32, #tpu.memory_space<any>>
    %47 = tpu.memref_squeeze %46 : memref<1x8x32xf32, #tpu.memory_space<any>> -> memref<8x32xf32, #tpu.memory_space<any>>
    %48 = tpu.memref_slice %arg3[%c3_i32_30] : memref<4x!tpu.dma_semaphore, #tpu.memory_space<semaphore_mem>> -> memref<1x!tpu.dma_semaphore, #tpu.memory_space<semaphore_mem>>
    %49 = tpu.memref_squeeze %48 : memref<1x!tpu.dma_semaphore, #tpu.memory_space<semaphore_mem>> -> memref<!tpu.dma_semaphore, #tpu.memory_space<semaphore_mem>>
    tpu.wait_dma2 semaphore(%49 : memref<!tpu.dma_semaphore, #tpu.memory_space<semaphore_mem>>) src(%45 : memref<8x32xf32, #tpu.memory_space<any>>) dst(%47 : memref<8x32xf32, #tpu.memory_space<any>>)
    return
  }
}

</mosaic_0001>

<bundles_post_ra>
// kernel: tpu_custom_call.1
= control target key start
LH: loop header
LB: loop body
LE: loop exit
PB: predicated region body
PF: predicated region fallthrough
CT: control target
= control target key end

     0   :  { %s241_s6 = smov 0   ;;  %s257_s0 = inlined_call_operand.hbm [shape: f32[4,32,32], index: 0, kind: input, shape index: {}]   ;;  %s258_s1 = inlined_call_operand.hbm [shape: f32[4,32,32], index: 1, kind: output, shape index: {}]  }
   0x1 LB: > { %s181_s7 = sshll.u32 %s220_s6, 7  ;;  %s182_s8 = sshll.u32 %s220_s6, 9  ;;  %s220_s6 = sphi %s241_s6, %s11_s6  }
   0x2   : > { %s15_s11 = scalar_lea.hbm %s257_s0, %s181_s7  ;;  %s18_s14 = scalar_lea.hbm %s258_s1, %s182_s8 }
   0x3   : > { %s135_s15 = scalar_lea.hbm %s15_s11, 512  ;;  %s222_s16 = smov [#allocation2]  }
   0x4   : > { %s223_s17 = smov [#allocation3]   ;;  %s224_s18 = smov 0  }
   0x5   : > { %31 = dma.general %s15_s11, 128, %s18_s14, %s222_s16, %s223_s17, [#allocation4], %s224_s18, 0  }
   0x6   : > { %s139_s19 = scalar_lea.hbm %s18_s14, 128  ;;  %s143_s20 = scalar_lea.hbm %s15_s11, 1024 }
   0x7   : > { %s225_s21 = smov [#allocation2 + $0x1]   ;;  %s226_s22 = smov [#allocation5]  }
   0x8   : > { %51 = dma.general %s135_s15, 128, %s139_s19, %s225_s21, %s226_s22, [#allocation6], %s224_s18, 0  }
   0x9   : > { %s147_s23 = scalar_lea.hbm %s18_s14, 256  ;;  %s151_s24 = scalar_lea.hbm %s15_s11, 1536 }
   0xa   : > { %s227_s25 = smov [#allocation2 + $0x2]   ;;  %s228_s26 = smov [#allocation7]  }
   0xb   : > { %71 = dma.general %s143_s20, 128, %s147_s23, %s227_s25, %s228_s26, [#allocation8], %s224_s18, 0  }
   0xc   : > { %s155_s27 = scalar_lea.hbm %s18_s14, 384  ;;  %s229_s28 = smov [#allocation2 + $0x3]  }
   0xd   : > { %s230_s29 = smov [#allocation9]  }
   0xe   : > { %91 = dma.general %s151_s24, 128, %s155_s27, %s229_s28, %s230_s29, [#allocation10], %s224_s18, 0  }
   0xf   : > { %210 = dma.done.wait [#allocation2], 128 }
  0x10   : > { %211 = vsyncadd [#allocation2], 4294967168 }
  0x11   : > { %212 = dma.done.wait [#allocation2 + $0x1], 128 }
  0x12   : > { %213 = vsyncadd [#allocation2 + $0x1], 4294967168 }
  0x13   : > { %214 = dma.done.wait [#allocation2 + $0x2], 128 }
  0x14   : > { %215 = vsyncadd [#allocation2 + $0x2], 4294967168 }
  0x15   : > { %216 = dma.done.wait [#allocation2 + $0x3], 128 }
  0x16   : > { %217 = vsyncadd [#allocation2 + $0x3], 4294967168  ;;  %s11_s6 = sadd.s32 1, %s220_s6  }
  0x17   : > { %p8_p0 = scmp.ge.s32.totalorder %s11_s6, 4  }
  0x19   :  { %10 = sbr.rel (!%p8_p0) target bundleno = 1 (0x1), region = 33 }
  0x20   :  { %101 = vsyncmov [#allocation2] }
  0x23   :  { %s102_s30 = vpop.sfrf %101 }
  0x24   :  { %p177_p1 = scmp.ne.s32.totalorder %s102_s30, 0 }
  0x26   :  { %106 = shalt.err (%p177_p1)  }
  0x27   :  { %108 = vsyncmov [#allocation2 + $0x1] }
  0x2a   :  { %s109_s2 = vpop.sfrf %108 }
  0x2b   :  { %p178_p2 = scmp.ne.s32.totalorder %s109_s2, 0 }
  0x2d   :  { %113 = shalt.err (%p178_p2)  }
  0x2e   :  { %115 = vsyncmov [#allocation2 + $0x2] }
  0x31   :  { %s116_s3 = vpop.sfrf %115 }
  0x32   :  { %p179_p3 = scmp.ne.s32.totalorder %s116_s3, 0 }
  0x34   :  { %120 = shalt.err (%p179_p3)  }
  0x35   :  { %122 = vsyncmov [#allocation2 + $0x3] }
  0x38   :  { %s123_s4 = vpop.sfrf %122 }
  0x39   :  { %p180_p4 = scmp.ne.s32.totalorder %s123_s4, 0 }
  0x3b   :  { %127 = shalt.err (%p180_p4)  }

</bundles_post_ra>
